<compile_context>
chip_gen: v6e
topology: v6e:2x2x1
jax: 0.10.0
libtpu: 0.0.40
codegen_flags: <defaults>
</compile_context>

<pallas_src>
import functools

import jax
import jax.numpy as jnp
from jax.experimental import pallas as pl
from jax.experimental.pallas import tpu as pltpu

_LANE = 128
_SUBLANE = 8
_CHUNK = _LANE * _SUBLANE  # 1024 elements = one f32 vreg


def _cdiv(a, b):
    return (a + b - 1) // b


def _masked_mse_kernel(p_ref, t_ref, m_ref, out_ref, *, nb, bps, r8, needs_mask):
    c = pl.program_id(0)  # TensorCore split ("parallel")
    i = pl.program_id(1)  # reduction step  ("arbitrary")

    @pl.when(i == 0)
    def _():
        out_ref[...] = jnp.zeros_like(out_ref)

    p = p_ref[...].astype(jnp.float32)
    t = t_ref[...].astype(jnp.float32)
    m = m_ref[...].astype(jnp.float32)
    d = p - t
    sq = d * d * m  # masked squared error
    cnt = m         # mask count contribution

    if needs_mask:
        # Rows past the logical end (partial boundary block, or a clamped duplicate
        # block on an uneven core split) must contribute nothing. jnp.where selects,
        # so garbage (even NaN) in out-of-range rows cannot propagate.
        row0 = (c * bps + i) * nb
        rows = jax.lax.broadcasted_iota(jnp.int32, (nb, _SUBLANE, _LANE), 0) + row0
        valid = rows < r8
        sq = jnp.where(valid, sq, 0.0)
        cnt = jnp.where(valid, cnt, 0.0)

    # Fold the (nb, 8, 128) tile into (8, 128) vreg accumulators resident in the
    # output block: pure VPU adds, no per-step cross-lane (XLU) reduction.
    out_ref[0, 0, :, :] += jnp.sum(sq, axis=0)
    out_ref[0, 1, :, :] += jnp.sum(cnt, axis=0)


def masked_mse_loss(predict, target, mask, *, block_vregs=256):
    """sum((predict - target)**2 * mask) / mask.sum(); 0 when mask.sum() == 0."""
    n = predict.size
    p = predict.reshape(-1)
    t = target.reshape(-1)
    m = mask.reshape(-1)
    if m.dtype == jnp.bool_:
        m = m.astype(jnp.float32)

    # View everything as (r8, 8, 128) vreg rows.
    r8 = _cdiv(n, _CHUNK)
    pad = r8 * _CHUNK - n
    if pad:
        # Only hit when n % 1024 != 0; zero pad contributes nothing to either sum.
        p = jnp.pad(p, (0, pad))
        t = jnp.pad(t, (0, pad))
        m = jnp.pad(m, (0, pad))
    p = p.reshape(r8, _SUBLANE, _LANE)
    t = t.reshape(r8, _SUBLANE, _LANE)
    m = m.reshape(r8, _SUBLANE, _LANE)

    # Tile size: block_vregs=256 -> 1 MiB f32 per input tile; with 3 inputs x 2
    # pipeline buffers that is 6 MiB, safe even under v5e's 16 MiB default scoped
    # VMEM, while large enough to amortize per-grid-step overhead.
    nb = max(1, min(block_vregs, r8))
    tb = _cdiv(r8, nb)              # total input blocks
    nsplit = 2 if tb >= 2 else 1    # feed both v7x TensorCores when there is work
    bps = _cdiv(tb, nsplit)         # blocks per split
    needs_clamp = nsplit * bps != tb
    needs_mask = nsplit * bps * nb != r8

    if needs_clamp:
        in_idx = lambda c, i: (jnp.minimum(c * bps + i, tb - 1), 0, 0)
    else:
        in_idx = lambda c, i: (c * bps + i, 0, 0)
    in_spec = pl.BlockSpec((nb, _SUBLANE, _LANE), in_idx)

    kernel = functools.partial(
        _masked_mse_kernel, nb=nb, bps=bps, r8=r8, needs_mask=needs_mask)

    partials = pl.pallas_call(
        kernel,
        out_shape=jax.ShapeDtypeStruct((nsplit, 2, _SUBLANE, _LANE), jnp.float32),
        grid_spec=pltpu.PrefetchScalarGridSpec(
            num_scalar_prefetch=0,
            grid=(nsplit, bps),
            in_specs=[in_spec, in_spec, in_spec],
            out_specs=pl.BlockSpec((1, 2, _SUBLANE, _LANE),
                                   lambda c, i: (c, 0, 0, 0)),
        ),
        compiler_params=pltpu.CompilerParams(
            dimension_semantics=("parallel", "arbitrary")),
    )(p, t, m)

    # Final tiny cross-lane reduction of (nsplit, 2, 8, 128) partials in plain JAX.
    sse = jnp.sum(partials[:, 0])
    num_pixels = jnp.sum(partials[:, 1])
    # matches the PyTorch `if num_pixels > 0` guard
    return jnp.where(num_pixels > 0, sse / num_pixels, jnp.float32(0.0))


if __name__ == "__main__":
    key = jax.random.PRNGKey(0)
    k1, k2, k3 = jax.random.split(key, 3)

    def ref_loss(pp, tt, mm):
        ppf = pp.astype(jnp.float32)
        ttf = tt.astype(jnp.float32)
        mmf = mm.astype(jnp.float32)
        npix = mmf.sum()
        return jnp.where(npix > 0, jnp.sum((ppf - ttf) ** 2 * mmf) / npix, 0.0)

    # NCHW, same convention as the PyTorch module
    B, C, H, W = 2, 4, 16, 16
    predict = jax.random.normal(k1, (B, C, H, W), dtype=jnp.float32)
    target = jax.random.normal(k2, (B, C, H, W), dtype=jnp.float32)
    mask = (jax.random.uniform(k3, (B, C, H, W)) > 0.5).astype(jnp.float32)

    loss = jax.block_until_ready(masked_mse_loss(predict, target, mask))
    assert jnp.allclose(loss, ref_loss(predict, target, mask),
                        rtol=1e-5, atol=1e-6), loss

    # all-zero mask path -> exactly 0
    zloss = jax.block_until_ready(
        masked_mse_loss(predict, target, jnp.zeros_like(mask)))
    assert jnp.allclose(zloss, 0.0), zloss

    # Ragged paths with tiny blocks:
    #  (a) odd block count -> clamped index_map + row-validity masking + 2-way split
    p2 = jax.random.normal(k1, (2, 4, 18, 18), dtype=jnp.float32)
    t2 = jax.random.normal(k2, (2, 4, 18, 18), dtype=jnp.float32)
    m2 = (jax.random.uniform(k3, (2, 4, 18, 18)) > 0.5).astype(jnp.float32)
    loss2 = jax.block_until_ready(masked_mse_loss(p2, t2, m2, block_vregs=1))
    assert jnp.allclose(loss2, ref_loss(p2, t2, m2), rtol=1e-5, atol=1e-6), loss2

    #  (b) boundary block overrunning the array -> in-kernel tail masking
    p3 = jax.random.normal(k1, (1, 1, 40, 64), dtype=jnp.float32)
    t3 = jax.random.normal(k2, (1, 1, 40, 64), dtype=jnp.float32)
    m3 = (jax.random.uniform(k3, (1, 1, 40, 64)) > 0.5).astype(jnp.float32)
    loss3 = jax.block_until_ready(masked_mse_loss(p3, t3, m3, block_vregs=2))
    assert jnp.allclose(loss3, ref_loss(p3, t3, m3), rtol=1e-5, atol=1e-6), loss3

    print("KERNEL_OK")
</pallas_src>

<mosaic_0001>
module attributes {stable_mosaic.version = 11 : i64} {
  func.func @_masked_mse_kernel(%arg0: i32, %arg1: i32, %arg2: memref<2x8x128xf32, #tpu.memory_space<vmem>>, %arg3: memref<2x8x128xf32, #tpu.memory_space<vmem>>, %arg4: memref<2x8x128xf32, #tpu.memory_space<vmem>>, %arg5: memref<1x2x8x128xf32, #tpu.memory_space<vmem>>) attributes {dimension_semantics = [#tpu.dimension_semantics<parallel>, #tpu.dimension_semantics<arbitrary>], iteration_bounds = array<i64: 1, 1>, scalar_prefetch = 0 : i64, scratch_operands = 0 : i64, tpu.core_type = #tpu.core_type<tc>, window_params = [{transform_indices = @transform_0, window_bounds = array<i64: 2, 8, 128>}, {transform_indices = @transform_1, window_bounds = array<i64: 2, 8, 128>}, {transform_indices = @transform_2, window_bounds = array<i64: 2, 8, 128>}, {transform_indices = @transform_3, window_bounds = array<i64: 1, 2, 8, 128>}]} {
    %c0_i32 = arith.constant 0 : i32
    %0 = arith.cmpi eq, %arg1, %c0_i32 : i32
    %1 = arith.extui %0 : i1 to i32
    %c0_i32_0 = arith.constant 0 : i32
    %2 = arith.cmpi ne, %1, %c0_i32_0 : i32
    scf.if %2 {
      %cst_25 = arith.constant 0.000000e+00 : f32
      %23 = vector.broadcast %cst_25 : f32 to vector<1x2x8x128xf32>
      %c0_26 = arith.constant 0 : index
      %c0_27 = arith.constant 0 : index
      %c0_28 = arith.constant 0 : index
      %c0_29 = arith.constant 0 : index
      %24 = vector.load %arg5[%c0_26, %c0_27, %c0_28, %c0_29] : memref<1x2x8x128xf32, #tpu.memory_space<vmem>>, vector<1x2x8x128xf32>
      tpu.vector_store %arg5[%c0_26, %c0_27, %c0_28, %c0_29], %23 {strides = array<i32>} : memref<1x2x8x128xf32, #tpu.memory_space<vmem>>, vector<1x2x8x128xf32>,
    } else {
    }
    %c0 = arith.constant 0 : index
    %c0_1 = arith.constant 0 : index
    %c0_2 = arith.constant 0 : index
    %3 = vector.load %arg2[%c0, %c0_1, %c0_2] : memref<2x8x128xf32, #tpu.memory_space<vmem>>, vector<2x8x128xf32>
    %c0_3 = arith.constant 0 : index
    %c0_4 = arith.constant 0 : index
    %c0_5 = arith.constant 0 : index
    %4 = vector.load %arg3[%c0_3, %c0_4, %c0_5] : memref<2x8x128xf32, #tpu.memory_space<vmem>>, vector<2x8x128xf32>
    %c0_6 = arith.constant 0 : index
    %c0_7 = arith.constant 0 : index
    %c0_8 = arith.constant 0 : index
    %5 = vector.load %arg4[%c0_6, %c0_7, %c0_8] : memref<2x8x128xf32, #tpu.memory_space<vmem>>, vector<2x8x128xf32>
    %6 = arith.subf %3, %4 : vector<2x8x128xf32>
    %7 = arith.mulf %6, %6 : vector<2x8x128xf32>
    %8 = arith.mulf %7, %5 : vector<2x8x128xf32>
    %c0_9 = arith.constant 0 : index
    %c0_10 = arith.constant 0 : index
    %c0_11 = arith.constant 0 : index
    %c0_12 = arith.constant 0 : index
    %9 = vector.load %arg5[%c0_9, %c0_10, %c0_11, %c0_12] : memref<1x2x8x128xf32, #tpu.memory_space<vmem>>, vector<1x1x8x128xf32>
    %10 = vector.shape_cast %9 : vector<1x1x8x128xf32> to vector<8x128xf32>
    %cst = arith.constant dense<0.000000e+00> : vector<8x128xf32>
    %11 = vector.multi_reduction <add>, %8, %cst [0] : vector<2x8x128xf32> to vector<8x128xf32>
    %12 = arith.addf %10, %11 : vector<8x128xf32>
    %c0_13 = arith.constant 0 : index
    %c0_14 = arith.constant 0 : index
    %c0_15 = arith.constant 0 : index
    %c0_16 = arith.constant 0 : index
    %13 = vector.load %arg5[%c0_13, %c0_14, %c0_15, %c0_16] : memref<1x2x8x128xf32, #tpu.memory_space<vmem>>, vector<1x1x8x128xf32>
    %14 = vector.shape_cast %13 : vector<1x1x8x128xf32> to vector<8x128xf32>
    %15 = vector.shape_cast %12 : vector<8x128xf32> to vector<1x1x8x128xf32>
    tpu.vector_store %arg5[%c0_13, %c0_14, %c0_15, %c0_16], %15 {strides = array<i32>} : memref<1x2x8x128xf32, #tpu.memory_space<vmem>>, vector<1x1x8x128xf32>,
    %c0_17 = arith.constant 0 : index
    %c1 = arith.constant 1 : index
    %c0_18 = arith.constant 0 : index
    %c0_19 = arith.constant 0 : index
    %16 = vector.load %arg5[%c0_17, %c1, %c0_18, %c0_19] : memref<1x2x8x128xf32, #tpu.memory_space<vmem>>, vector<1x1x8x128xf32>
    %17 = vector.shape_cast %16 : vector<1x1x8x128xf32> to vector<8x128xf32>
    %cst_20 = arith.constant dense<0.000000e+00> : vector<8x128xf32>
    %18 = vector.multi_reduction <add>, %5, %cst_20 [0] : vector<2x8x128xf32> to vector<8x128xf32>
    %19 = arith.addf %17, %18 : vector<8x128xf32>
    %c0_21 = arith.constant 0 : index
    %c1_22 = arith.constant 1 : index
    %c0_23 = arith.constant 0 : index
    %c0_24 = arith.constant 0 : index
    %20 = vector.load %arg5[%c0_21, %c1_22, %c0_23, %c0_24] : memref<1x2x8x128xf32, #tpu.memory_space<vmem>>, vector<1x1x8x128xf32>
    %21 = vector.shape_cast %20 : vector<1x1x8x128xf32> to vector<8x128xf32>
    %22 = vector.shape_cast %19 : vector<8x128xf32> to vector<1x1x8x128xf32>
    tpu.vector_store %arg5[%c0_21, %c1_22, %c0_23, %c0_24], %22 {strides = array<i32>} : memref<1x2x8x128xf32, #tpu.memory_space<vmem>>, vector<1x1x8x128xf32>,
    return
  }
  func.func @transform_0(%arg0: i32, %arg1: i32) -> (i32, i32, i32) {
    %c1_i32 = arith.constant 1 : i32
    %0 = arith.muli %arg0, %c1_i32 : i32
    %1 = arith.addi %0, %arg1 : i32
    %c0_i32 = arith.constant 0 : i32
    %c0_i32_0 = arith.constant 0 : i32
    %c0_i32_1 = arith.constant 0 : i32
    return %1, %c0_i32, %c0_i32_0 : i32, i32, i32
  }
  func.func @transform_1(%arg0: i32, %arg1: i32) -> (i32, i32, i32) {
    %c1_i32 = arith.constant 1 : i32
    %0 = arith.muli %arg0, %c1_i32 : i32
    %1 = arith.addi %0, %arg1 : i32
    %c0_i32 = arith.constant 0 : i32
    %c0_i32_0 = arith.constant 0 : i32
    %c0_i32_1 = arith.constant 0 : i32
    return %1, %c0_i32, %c0_i32_0 : i32, i32, i32
  }
  func.func @transform_2(%arg0: i32, %arg1: i32) -> (i32, i32, i32) {
    %c1_i32 = arith.constant 1 : i32
    %0 = arith.muli %arg0, %c1_i32 : i32
    %1 = arith.addi %0, %arg1 : i32
    %c0_i32 = arith.constant 0 : i32
    %c0_i32_0 = arith.constant 0 : i32
    %c0_i32_1 = arith.constant 0 : i32
    return %1, %c0_i32, %c0_i32_0 : i32, i32, i32
  }
  func.func @transform_3(%arg0: i32, %arg1: i32) -> (i32, i32, i32, i32) {
    %c0_i32 = arith.constant 0 : i32
    %c0_i32_0 = arith.constant 0 : i32
    %c0_i32_1 = arith.constant 0 : i32
    %c0_i32_2 = arith.constant 0 : i32
    return %arg0, %c0_i32, %c0_i32_0, %c0_i32_1 : i32, i32, i32, i32
  }
}

</mosaic_0001>

<bundles_post_ra>
// kernel: tpu_custom_call.1
= control target key start
LH: loop header
LB: loop body
LE: loop exit
PB: predicated region body
PF: predicated region fallthrough
CT: control target
= control target key end

     0   :  { %8 = vsyncpa [#allocation3], 0  ;;  %s262_s0 = inlined_call_operand.hbm [shape: f32[2,8,128], index: 0, kind: input, shape index: {}]   ;;  %s263_s1 = inlined_call_operand.hbm [shape: f32[2,8,128], index: 1, kind: input, shape index: {}]   ;;  %s264_s2 = inlined_call_operand.hbm [shape: f32[2,8,128], index: 2, kind: input, shape index: {}]   ;;  %s265_s3 = inlined_call_operand.hbm [shape: f32[1,2,8,128], index: 3, kind: output, shape index: {}]  }
   0x1   :  { %9 = vsyncpa [#allocation6], 0 }
   0x2   :  { %10 = vsyncpa [#allocation4], 0  ;;  %s212_s12 = smov [#allocation5]   ;;  %s213_s14 = smov [#allocation2]  }
   0x3   :  { %s36_s13 = sshll.u32 %s212_s12, 4  ;;  %s20_s15 = sshll.u32 %s213_s14, 4  ;;  %s37_s13 = int_to_ptr.vmem [resolvable:$true] %s36_s13  ;;  %s21_s15 = int_to_ptr.vmem [resolvable:$true] %s20_s15 }
   0x4   :  { %s134_s16 = scalar_lea.vmem %s37_s13, 256  ;;  %p139_p1 = scmp.lt.s32.totalorder %s37_s13, %s37_s13 }
   0x5   :  { %p135_p0 = scmp.ne.s32.totalorder %s37_s13, %s134_s16  ;;  %p140_p2 = scmp.lt.s32.totalorder %s134_s16, %s134_s16 }
   0x7   :  { %p141_p3 = por %p140_p2, %p139_p1 }
   0x9   :  { %p142_p4 = pnand %p141_p3, %p135_p0 }
   0xb   :  { %145 = shalt.err (!%p142_p4)
}
   0xc   :  { %s214_s17 = smov 128   ;;  %s215_s18 = smov 8  }
   0xd   :  { %42 = dma.hbm_to_vmem [thread:$0]  %s263_s1, 256, %s37_s13, [#allocation6], %s214_s17, %s214_s17, %s215_s18  }
   0xe   :  { %s154_s21 = scalar_lea.vmem %s21_s15, 256  ;;  %p159_p6 = scmp.lt.s32.totalorder %s21_s15, %s21_s15 }
   0xf   :  { %p155_p5 = scmp.ne.s32.totalorder %s21_s15, %s154_s21  ;;  %p160_p7 = scmp.lt.s32.totalorder %s154_s21, %s154_s21 }
  0x11   :  { %p161_p8 = por %p160_p7, %p159_p6 }
  0x13   :  { %p162_p9 = pnand %p161_p8, %p155_p5 }
  0x15   :  { %165 = shalt.err (!%p162_p9)
}
  0x16   :  { %26 = dma.hbm_to_vmem [thread:$0]  %s262_s0, 256, %s21_s15, [#allocation3], %s214_s17, %s214_s17, %s215_s18  }
  0x17   :  { %s216_s24 = smov [#allocation7]  }
  0x18   :  { %s52_s25 = sshll.u32 %s216_s24, 4  ;;  %s53_s25 = int_to_ptr.vmem [resolvable:$true] %s52_s25 }
  0x19   :  { %s174_s26 = scalar_lea.vmem %s53_s25, 256  ;;  %p179_p11 = scmp.lt.s32.totalorder %s53_s25, %s53_s25 }
  0x1a   :  { %p175_p10 = scmp.ne.s32.totalorder %s53_s25, %s174_s26  ;;  %p180_p12 = scmp.lt.s32.totalorder %s174_s26, %s174_s26 }
  0x1c   :  { %p181_p13 = por %p180_p12, %p179_p11 }
  0x1e   :  { %p182_p0 = pnand %p181_p13, %p175_p10 }
  0x20   :  { %185 = shalt.err (!%p182_p0)
}
  0x21   :  { %58 = dma.hbm_to_vmem [thread:$0]  %s264_s2, 256, %s53_s25, [#allocation6], %s214_s17, %s214_s17, %s215_s18  }
  0x22   :  { %206 = dma.done.wait [#allocation3], 256  }
  0x23   :  { %207 = vsyncadd [#allocation3], 4294967040 }
  0x24   :  { %208 = dma.done.wait [#allocation6], 512  }
  0x25   :  { %209 = vsyncadd [#allocation6], 4294966784  ;;  %v80_v0 = vld [vmem:[#allocation2] sm:$0xff]  ;;  %v81_v1 = vld [vmem:[#allocation2 + $0x8] sm:$0xff]  ;;  %s217_s0 = smov [#allocation8]  }
  0x26   :  { %v82_v2 = vld [vmem:[#allocation5] sm:$0xff]  ;;  %v83_v3 = vld [vmem:[#allocation5 + $0x8] sm:$0xff]  ;;  %v84_v4 = vld [vmem:[#allocation7] sm:$0xff]  ;;  %s106_s2 = sshll.u32 %s217_s0, 4  ;;  %s107_s2 = int_to_ptr.vmem [resolvable:$true] %s106_s2 }
  0x27   :  { %v85_v5 = vld [vmem:[#allocation7 + $0x8] sm:$0xff]  ;;  %v86_v6 = vsub.f32 %v80_v0, %v82_v2  ;;  %v87_v7 = vsub.f32 %v81_v1, %v83_v3  ;;  %s186_s28 = scalar_lea.vmem %s107_s2, 256  ;;  %p191_p2 = scmp.lt.s32.totalorder %s107_s2, %s107_s2 }
  0x28   :  { %v98_v8 = vadd.f32 %v85_v5, %v84_v4  ;;  %p187_p1 = scmp.ne.s32.totalorder %s107_s2, %s186_s28  ;;  %p192_p3 = scmp.lt.s32.totalorder %s186_s28, %s186_s28 }
  0x29   :  { %v88_v9 = vmul.f32 %v86_v6, %v86_v6  ;;  %v89_v10 = vmul.f32 %v87_v7, %v87_v7 }
  0x2a   :  { %100 = vst [vmem:[#allocation8 + $0x8] sm:$0xff] %v98_v8  ;;  %p193_p4 = por %p192_p3, %p191_p2 }
  0x2b   :  { %v90_v11 = vmul.f32 %v88_v9, %v84_v4  ;;  %v91_v12 = vmul.f32 %v89_v10, %v85_v5 }
  0x2c   :  { %p194_p5 = pnand %p193_p4, %p187_p1 }
  0x2d   :  { %v93_v13 = vadd.f32 %v91_v12, %v90_v11 }
  0x2f   :  { %95 = vst [vmem:[#allocation8] sm:$0xff] %v93_v13 }
  0x30   :  { %197 = shalt.err (!%p194_p5)
}
  0x31   :  { %112 = dma.vmem_to_hbm [thread:$0]  %s107_s2, 256, %s265_s3, [#allocation4], %s214_s17, %s214_s17, %s215_s18  }
  0x32   :  { %210 = dma.done.wait [#allocation4], 256  }
  0x33   :  { %211 = vsyncadd [#allocation4], 4294967040 }
  0x34   :  { %116 = vsyncpa [#allocation3], 1 }
  0x35   :  { %117 = vsyncpa [#allocation6], 1 }
  0x36   :  { %118 = vsyncpa [#allocation4], 1 }

</bundles_post_ra>
